<compile_context>
chip_gen: v7x
topology: tpu7x:2x2x1
jax: 0.10.0
libtpu: 0.0.40
codegen_flags: <defaults>
</compile_context>

<pallas_src>
import jax
import jax.numpy as jnp
from jax.experimental import pallas as pl
from jax.experimental.pallas import tpu as pltpu


# ------------------------------------------------------------------ helpers --
def _bilinear_matrix(n_in, n_out):
    """(n_out, n_in) interpolation matrix for align_corners=True bilinear resize."""
    i = jnp.arange(n_out, dtype=jnp.float32)
    src = i * (n_in - 1) / (n_out - 1)
    f0 = jnp.clip(jnp.floor(src).astype(jnp.int32), 0, n_in - 1)
    f1 = jnp.minimum(f0 + 1, n_in - 1)
    frac = src - f0.astype(jnp.float32)
    rows = jnp.arange(n_out)
    m = jnp.zeros((n_out, n_in), jnp.float32)
    m = m.at[rows, f0].add(1.0 - frac)
    m = m.at[rows, f1].add(frac)
    return m


def _pad_rows(mat, n_out, pad_before):
    """out[r] = mat[r - pad_before], zero outside (implements F.pad on one axis)."""
    n_up = mat.shape[0]
    out = jnp.zeros((n_out,) + mat.shape[1:], mat.dtype)
    r0 = max(pad_before, 0)
    r1 = min(pad_before + n_up, n_out)
    if r1 > r0:
        out = out.at[r0:r1].set(mat[r0 - pad_before:r1 - pad_before])
    return out


def _band_weights(w_hwio, W):
    """w_hwio: (3, 3, Cin, Cout) -> (3, W*Cin, W*Cout) banded matrices, one per
    kernel row dy.  out[h, w*Cout+co] += x[h+dy-1, wp*Cin+c] * band[dy, wp*Cin+c, w*Cout+co]
    with the conv's padding=1 (zero) along W folded into the band structure."""
    _, _, Cin, Cout = w_hwio.shape
    wp = jnp.arange(W)[:, None]
    w = jnp.arange(W)[None, :]
    dx = wp - w + 1                                    # input col = w + dx - 1
    valid = ((dx >= 0) & (dx < 3)).astype(w_hwio.dtype)
    dxc = jnp.clip(dx, 0, 2)
    g = w_hwio[:, dxc, :, :]                           # (3, W, W, Cin, Cout)
    g = g * valid[None, :, :, None, None]
    g = jnp.transpose(g, (0, 1, 3, 2, 4))              # (3, W, Cin, W, Cout)
    return g.reshape(3, W * Cin, W * Cout)


# ------------------------------------------------------------- fused kernel --
def _up_doubleconv_kernel(x1_ref, x2_ref, uh_ref, uw_ref,
                          w1a_ref, w1b_ref, b1_ref,
                          w2_ref, b2_ref, a1_ref, a2_ref, o_ref):
    f32 = jnp.float32
    bf16 = jnp.bfloat16
    x1 = x1_ref[0]                                   # (H1, W1*C1)  f32
    x2 = x2_ref[0]                                   # (H2, W2*C2)  f32

    # --- bilinear 2x upsample (align_corners=True) + F.pad, as two matmuls ---
    t = jnp.dot(uh_ref[...], x1, preferred_element_type=f32)     # (H2, W1*C1)
    x1u = jnp.dot(t, uw_ref[...], preferred_element_type=f32)    # (H2, W2*C1)

    def conv3x3(x2d, wband_ref):
        # x2d: (H, W*Cin) f32; wband_ref: (3, W*Cin, W*Cout) bf16 banded weights
        # (padding=1 along W and the BN scale already folded into the weights).
        zrow = jnp.zeros((1, x2d.shape[1]), f32)
        x_m1 = jnp.concatenate([zrow, x2d[:-1, :]], axis=0)   # row h -> input row h-1
        x_p1 = jnp.concatenate([x2d[1:, :], zrow], axis=0)    # row h -> input row h+1
        acc = jnp.dot(x_m1.astype(bf16), wband_ref[0], preferred_element_type=f32)
        acc = acc + jnp.dot(x2d.astype(bf16), wband_ref[1], preferred_element_type=f32)
        acc = acc + jnp.dot(x_p1.astype(bf16), wband_ref[2], preferred_element_type=f32)
        return acc

    # --- conv1 over channel-concat([x2, x1_up]) == conv(x2, Wa) + conv(x1u, Wb)
    h = conv3x3(x2, w1a_ref) + conv3x3(x1u, w1b_ref) + b1_ref[...]
    h = jnp.where(h > 0, h, a1_ref[...] * h)                     # PReLU (shared a)

    # --- conv2 ---
    h = conv3x3(h, w2_ref) + b2_ref[...]
    h = jnp.where(h > 0, h, a2_ref[...] * h)

    o_ref[0] = h                                                 # (H2, W2*Cout)


# ------------------------------------------------------------------ wrapper --
@jax.jit
def up_forward(x1_nchw, x2_nchw, params):
    N, C1, H1, W1 = x1_nchw.shape
    N2, C2, H2, W2 = x2_nchw.shape
    assert N == N2
    Cmid = params["w1"].shape[-1]
    Cout = params["w2"].shape[-1]
    eps = 1e-5

    # NCHW -> lane-dense (N, H, W*C)
    x1l = jnp.transpose(x1_nchw, (0, 2, 3, 1)).reshape(N, H1, W1 * C1).astype(jnp.float32)
    x2l = jnp.transpose(x2_nchw, (0, 2, 3, 1)).reshape(N, H2, W2 * C2).astype(jnp.float32)

    # bilinear x2 upsample + F.pad folded into two small matrices
    diffY, diffX = H2 - 2 * H1, W2 - 2 * W1
    uh = _pad_rows(_bilinear_matrix(H1, 2 * H1), H2, diffY // 2)            # (H2, H1)
    aw = _pad_rows(_bilinear_matrix(W1, 2 * W1), W2, diffX // 2)            # (W2, W1)
    uw = jnp.kron(aw.T, jnp.eye(C1, dtype=jnp.float32))                     # (W1*C1, W2*C1)

    # fold conv bias + inference-mode BN into the weights / one bias row
    def fold(w, b, bn):
        s = bn["gamma"] / jnp.sqrt(bn["var"] + eps)
        return w * s[None, None, None, :], (b - bn["mean"]) * s + bn["beta"]

    w1f, b1f = fold(params["w1"], params["b1"], params["bn1"])
    w2f, b2f = fold(params["w2"], params["b2"], params["bn2"])

    # split conv1 along input channels: torch.cat([x2, x1], dim=1) -> x2 first
    w1a = _band_weights(w1f[:, :, :C2, :], W2).astype(jnp.bfloat16)   # acts on x2
    w1b = _band_weights(w1f[:, :, C2:, :], W2).astype(jnp.bfloat16)   # acts on up(x1)
    w2b = _band_weights(w2f, W2).astype(jnp.bfloat16)
    b1r = jnp.tile(b1f, (W2,)).reshape(1, W2 * Cmid).astype(jnp.float32)
    b2r = jnp.tile(b2f, (W2,)).reshape(1, W2 * Cout).astype(jnp.float32)
    a1 = params["prelu1"].reshape(1, 1).astype(jnp.float32)
    a2 = params["prelu2"].reshape(1, 1).astype(jnp.float32)

    out = pl.pallas_call(
        _up_doubleconv_kernel,
        out_shape=jax.ShapeDtypeStruct((N, H2, W2 * Cout), jnp.float32),
        grid=(N,),
        in_specs=[
            pl.BlockSpec((1, H1, W1 * C1), lambda n: (n, 0, 0)),
            pl.BlockSpec((1, H2, W2 * C2), lambda n: (n, 0, 0)),
            pl.BlockSpec((H2, H1), lambda n: (0, 0)),
            pl.BlockSpec((W1 * C1, W2 * C1), lambda n: (0, 0)),
            pl.BlockSpec((3, W2 * C2, W2 * Cmid), lambda n: (0, 0, 0)),
            pl.BlockSpec((3, W2 * C1, W2 * Cmid), lambda n: (0, 0, 0)),
            pl.BlockSpec((1, W2 * Cmid), lambda n: (0, 0)),
            pl.BlockSpec((3, W2 * Cmid, W2 * Cout), lambda n: (0, 0, 0)),
            pl.BlockSpec((1, W2 * Cout), lambda n: (0, 0)),
            pl.BlockSpec((1, 1), lambda n: (0, 0)),
            pl.BlockSpec((1, 1), lambda n: (0, 0)),
        ],
        out_specs=pl.BlockSpec((1, H2, W2 * Cout), lambda n: (n, 0, 0)),
        compiler_params=pltpu.CompilerParams(dimension_semantics=("parallel",)),
    )(x1l, x2l, uh, uw, w1a, w1b, b1r, w2b, b2r, a1, a2)

    # (N, H2, W2*Cout) -> NCHW
    return jnp.transpose(out.reshape(N, H2, W2, Cout), (0, 3, 1, 2))


# ----------------------------------------------------- pure-JAX reference ----
def up_forward_reference(x1, x2, params):
    """f32 XLA reference of the same inference-mode forward pass."""
    N, C1, H1, W1 = x1.shape
    _, C2, H2, W2 = x2.shape
    eps = 1e-5
    ah = _pad_rows(_bilinear_matrix(H1, 2 * H1), H2, (H2 - 2 * H1) // 2)
    aw = _pad_rows(_bilinear_matrix(W1, 2 * W1), W2, (W2 - 2 * W1) // 2)
    x1u = jnp.einsum('uh,vw,nchw->ncuv', ah, aw, x1.astype(jnp.float32))
    x = jnp.concatenate([x2.astype(jnp.float32), x1u], axis=1)

    def conv_bn_prelu(x, w, b, bn, a):
        y = jax.lax.conv_general_dilated(
            x, jnp.transpose(w, (3, 2, 0, 1)),             # HWIO -> OIHW
            window_strides=(1, 1), padding=((1, 1), (1, 1)),
            dimension_numbers=('NCHW', 'OIHW', 'NCHW'))
        y = y + b[None, :, None, None]
        s = (bn["gamma"] / jnp.sqrt(bn["var"] + eps))[None, :, None, None]
        y = (y - bn["mean"][None, :, None, None]) * s + bn["beta"][None, :, None, None]
        return jnp.where(y > 0, y, a * y)

    h = conv_bn_prelu(x, params["w1"], params["b1"], params["bn1"], params["prelu1"])
    return conv_bn_prelu(h, params["w2"], params["b2"], params["bn2"], params["prelu2"])


# ---------------------------------------------------- deterministic params ---
def init_params(key, c_in_cat, c_mid, c_out):
    ks = jax.random.split(key, 6)

    def bn(k, c):
        k1, k2, k3, k4 = jax.random.split(k, 4)
        return {"gamma": 1.0 + 0.1 * jax.random.normal(k1, (c,), jnp.float32),
                "beta": 0.1 * jax.random.normal(k2, (c,), jnp.float32),
                "mean": 0.1 * jax.random.normal(k3, (c,), jnp.float32),
                "var": 1.0 + 0.1 * jnp.abs(jax.random.normal(k4, (c,), jnp.float32))}

    return {
        "w1": 0.2 * jax.random.normal(ks[0], (3, 3, c_in_cat, c_mid), jnp.float32),  # HWIO
        "b1": 0.1 * jax.random.normal(ks[1], (c_mid,), jnp.float32),
        "bn1": bn(ks[2], c_mid),
        "prelu1": jnp.asarray(0.25, jnp.float32),          # nn.PReLU() default init
        "w2": 0.2 * jax.random.normal(ks[3], (3, 3, c_mid, c_out), jnp.float32),
        "b2": 0.1 * jax.random.normal(ks[4], (c_out,), jnp.float32),
        "bn2": bn(ks[5], c_out),
        "prelu2": jnp.asarray(0.25, jnp.float32),
    }


if __name__ == "__main__":
    key = jax.random.PRNGKey(0)
    k1, k2, kp = jax.random.split(key, 3)
    # Up(in_channels=16, out_channels=16, bilinear=True):
    #   x1: deep feature (N, 8, 8, 8), bilinearly upsampled 2x
    #   x2: skip connection (N, 8, 16, 16)
    #   concat -> 16 channels; DoubleConv(16, 16, mid_channels=16 // 2 = 8)
    N, C1, H1, W1 = 2, 8, 8, 8
    C2, H2, W2 = 8, 16, 16
    Cmid, Cout = (C1 + C2) // 2, 16

    x1 = jax.random.normal(k1, (N, C1, H1, W1), jnp.float32)   # NCHW like PyTorch
    x2 = jax.random.normal(k2, (N, C2, H2, W2), jnp.float32)
    params = init_params(kp, C1 + C2, Cmid, Cout)

    out = jax.block_until_ready(up_forward(x1, x2, params))
    assert out.shape == (N, Cout, H2, W2), out.shape
    assert bool(jnp.all(jnp.isfinite(out)))

    ref = up_forward_reference(x1, x2, params)
    assert bool(jnp.allclose(out, ref, rtol=1e-1, atol=1e-1)), \
        float(jnp.max(jnp.abs(out - ref)))
    print("KERNEL_OK")
</pallas_src>

<mosaic_0001>
module attributes {stable_mosaic.version = 11 : i64} {
  func.func private @main(%arg0: i32) attributes {dimension_semantics = [#tpu.dimension_semantics<core_parallel>], iteration_bounds = array<i64: 2>, tpu.core_type = #tpu.core_type<sc_scalar_subcore>, window_params = []} {
    return
  }
}

module attributes {stable_mosaic.version = 11 : i64} {
  func.func private @main(%arg0: i32) attributes {dimension_semantics = [#tpu.dimension_semantics<core_parallel>], iteration_bounds = array<i64: 2>, tpu.core_type = #tpu.core_type<sc_scalar_subcore>, window_params = []} {
    return
  }
}

module attributes {stable_mosaic.version = 11 : i64} {
  func.func @_up_doubleconv_kernel(%arg0: i32, %arg1: memref<1x8x64xf32, #tpu.memory_space<vmem>>, %arg2: memref<1x16x128xf32, #tpu.memory_space<vmem>>, %arg3: memref<16x8xf32, #tpu.memory_space<vmem>>, %arg4: memref<64x128xf32, #tpu.memory_space<vmem>>, %arg5: memref<3x128x128xbf16, #tpu.memory_space<vmem>>, %arg6: memref<3x128x128xbf16, #tpu.memory_space<vmem>>, %arg7: memref<1x128xf32, #tpu.memory_space<vmem>>, %arg8: memref<3x128x256xbf16, #tpu.memory_space<vmem>>, %arg9: memref<1x256xf32, #tpu.memory_space<vmem>>, %arg10: memref<1x1xf32, #tpu.memory_space<vmem>>, %arg11: memref<1x1xf32, #tpu.memory_space<vmem>>, %arg12: memref<1x16x256xf32, #tpu.memory_space<vmem>>) attributes {dimension_semantics = [#tpu.dimension_semantics<parallel>], iteration_bounds = array<i64: 2>, scalar_prefetch = 0 : i64, scratch_operands = 0 : i64, tpu.core_type = #tpu.core_type<tc>, window_params = [{transform_indices = @transform_0, window_bounds = array<i64: 1, 8, 64>}, {transform_indices = @transform_1, window_bounds = array<i64: 1, 16, 128>}, {pipeline_mode = #tpu.pipeline_mode<synchronous>, transform_indices = @transform_2, window_bounds = array<i64: 16, 8>}, {pipeline_mode = #tpu.pipeline_mode<synchronous>, transform_indices = @transform_3, window_bounds = array<i64: 64, 128>}, {pipeline_mode = #tpu.pipeline_mode<synchronous>, transform_indices = @transform_4, window_bounds = array<i64: 3, 128, 128>}, {pipeline_mode = #tpu.pipeline_mode<synchronous>, transform_indices = @transform_5, window_bounds = array<i64: 3, 128, 128>}, {pipeline_mode = #tpu.pipeline_mode<synchronous>, transform_indices = @transform_6, window_bounds = array<i64: 1, 128>}, {pipeline_mode = #tpu.pipeline_mode<synchronous>, transform_indices = @transform_7, window_bounds = array<i64: 3, 128, 256>}, {pipeline_mode = #tpu.pipeline_mode<synchronous>, transform_indices = @transform_8, window_bounds = array<i64: 1, 256>}, {pipeline_mode = #tpu.pipeline_mode<synchronous>, transform_indices = @transform_9, window_bounds = array<i64: 1, 1>}, {pipeline_mode = #tpu.pipeline_mode<synchronous>, transform_indices = @transform_10, window_bounds = array<i64: 1, 1>}, {transform_indices = @transform_11, window_bounds = array<i64: 1, 16, 256>}]} {
    %c0 = arith.constant 0 : index
    %c0_0 = arith.constant 0 : index
    %c0_1 = arith.constant 0 : index
    %0 = vector.load %arg1[%c0, %c0_0, %c0_1] : memref<1x8x64xf32, #tpu.memory_space<vmem>>, vector<1x8x64xf32>
    %1 = vector.shape_cast %0 : vector<1x8x64xf32> to vector<8x64xf32>
    %c0_2 = arith.constant 0 : index
    %c0_3 = arith.constant 0 : index
    %c0_4 = arith.constant 0 : index
    %2 = vector.load %arg2[%c0_2, %c0_3, %c0_4] : memref<1x16x128xf32, #tpu.memory_space<vmem>>, vector<1x16x128xf32>
    %3 = vector.shape_cast %2 : vector<1x16x128xf32> to vector<16x128xf32>
    %c0_5 = arith.constant 0 : index
    %c0_6 = arith.constant 0 : index
    %4 = vector.load %arg3[%c0_5, %c0_6] : memref<16x8xf32, #tpu.memory_space<vmem>>, vector<16x8xf32>
    %cst = arith.constant dense<0.000000e+00> : vector<16x64xf32>
    %5 = tpu.matmul %4, %1, %cst {dimension_numbers = #tpu.dot_dimension_numbers<[1], [0], [0], [1], [0, 0, 1, 1], [], []>} : vector<16x8xf32>, vector<8x64xf32>, vector<16x64xf32> -> vector<16x64xf32>
    %c0_7 = arith.constant 0 : index
    %c0_8 = arith.constant 0 : index
    %6 = vector.load %arg4[%c0_7, %c0_8] : memref<64x128xf32, #tpu.memory_space<vmem>>, vector<64x128xf32>
    %cst_9 = arith.constant dense<0.000000e+00> : vector<16x128xf32>
    %7 = tpu.matmul %5, %6, %cst_9 {dimension_numbers = #tpu.dot_dimension_numbers<[1], [0], [0], [1], [0, 0, 1, 1], [], []>} : vector<16x64xf32>, vector<64x128xf32>, vector<16x128xf32> -> vector<16x128xf32>
    %cst_10 = arith.constant 0.000000e+00 : f32
    %8 = vector.broadcast %cst_10 : f32 to vector<1x128xf32>
    %9 = vector.extract_strided_slice %3 {offsets = [0, 0], sizes = [15, 128], strides = [1, 1]} : vector<16x128xf32> to vector<15x128xf32>
    %10 = tpu.concatenate %8, %9 in 0 : vector<1x128xf32>, vector<15x128xf32> -> vector<16x128xf32>
    %11 = vector.extract_strided_slice %3 {offsets = [1, 0], sizes = [15, 128], strides = [1, 1]} : vector<16x128xf32> to vector<15x128xf32>
    %12 = tpu.concatenate %11, %8 in 0 : vector<15x128xf32>, vector<1x128xf32> -> vector<16x128xf32>
    %13 = arith.truncf %10 : vector<16x128xf32> to vector<16x128xbf16>
    %c0_11 = arith.constant 0 : index
    %c0_12 = arith.constant 0 : index
    %c0_13 = arith.constant 0 : index
    %14 = vector.load %arg5[%c0_11, %c0_12, %c0_13] : memref<3x128x128xbf16, #tpu.memory_space<vmem>>, vector<1x128x128xbf16>
    %15 = vector.shape_cast %14 : vector<1x128x128xbf16> to vector<128x128xbf16>
    %cst_14 = arith.constant dense<0.000000e+00> : vector<16x128xf32>
    %16 = tpu.matmul %13, %15, %cst_14 {dimension_numbers = #tpu.dot_dimension_numbers<[1], [0], [0], [1], [0, 0, 1, 1], [], []>} : vector<16x128xbf16>, vector<128x128xbf16>, vector<16x128xf32> -> vector<16x128xf32>
    %17 = arith.truncf %3 : vector<16x128xf32> to vector<16x128xbf16>
    %c1 = arith.constant 1 : index
    %c0_15 = arith.constant 0 : index
    %c0_16 = arith.constant 0 : index
    %18 = vector.load %arg5[%c1, %c0_15, %c0_16] : memref<3x128x128xbf16, #tpu.memory_space<vmem>>, vector<1x128x128xbf16>
    %19 = vector.shape_cast %18 : vector<1x128x128xbf16> to vector<128x128xbf16>
    %cst_17 = arith.constant dense<0.000000e+00> : vector<16x128xf32>
    %20 = tpu.matmul %17, %19, %cst_17 {dimension_numbers = #tpu.dot_dimension_numbers<[1], [0], [0], [1], [0, 0, 1, 1], [], []>} : vector<16x128xbf16>, vector<128x128xbf16>, vector<16x128xf32> -> vector<16x128xf32>
    %21 = arith.addf %16, %20 : vector<16x128xf32>
    %22 = arith.truncf %12 : vector<16x128xf32> to vector<16x128xbf16>
    %c2 = arith.constant 2 : index
    %c0_18 = arith.constant 0 : index
    %c0_19 = arith.constant 0 : index
    %23 = vector.load %arg5[%c2, %c0_18, %c0_19] : memref<3x128x128xbf16, #tpu.memory_space<vmem>>, vector<1x128x128xbf16>
    %24 = vector.shape_cast %23 : vector<1x128x128xbf16> to vector<128x128xbf16>
    %cst_20 = arith.constant dense<0.000000e+00> : vector<16x128xf32>
    %25 = tpu.matmul %22, %24, %cst_20 {dimension_numbers = #tpu.dot_dimension_numbers<[1], [0], [0], [1], [0, 0, 1, 1], [], []>} : vector<16x128xbf16>, vector<128x128xbf16>, vector<16x128xf32> -> vector<16x128xf32>
    %26 = arith.addf %21, %25 : vector<16x128xf32>
    %cst_21 = arith.constant 0.000000e+00 : f32
    %27 = vector.broadcast %cst_21 : f32 to vector<1x128xf32>
    %28 = vector.extract_strided_slice %7 {offsets = [0, 0], sizes = [15, 128], strides = [1, 1]} : vector<16x128xf32> to vector<15x128xf32>
    %29 = tpu.concatenate %27, %28 in 0 : vector<1x128xf32>, vector<15x128xf32> -> vector<16x128xf32>
    %30 = vector.extract_strided_slice %7 {offsets = [1, 0], sizes = [15, 128], strides = [1, 1]} : vector<16x128xf32> to vector<15x128xf32>
    %31 = tpu.concatenate %30, %27 in 0 : vector<15x128xf32>, vector<1x128xf32> -> vector<16x128xf32>
    %32 = arith.truncf %29 : vector<16x128xf32> to vector<16x128xbf16>
    %c0_22 = arith.constant 0 : index
    %c0_23 = arith.constant 0 : index
    %c0_24 = arith.constant 0 : index
    %33 = vector.load %arg6[%c0_22, %c0_23, %c0_24] : memref<3x128x128xbf16, #tpu.memory_space<vmem>>, vector<1x128x128xbf16>
    %34 = vector.shape_cast %33 : vector<1x128x128xbf16> to vector<128x128xbf16>
    %cst_25 = arith.constant dense<0.000000e+00> : vector<16x128xf32>
    %35 = tpu.matmul %32, %34, %cst_25 {dimension_numbers = #tpu.dot_dimension_numbers<[1], [0], [0], [1], [0, 0, 1, 1], [], []>} : vector<16x128xbf16>, vector<128x128xbf16>, vector<16x128xf32> -> vector<16x128xf32>
    %36 = arith.truncf %7 : vector<16x128xf32> to vector<16x128xbf16>
    %c1_26 = arith.constant 1 : index
    %c0_27 = arith.constant 0 : index
    %c0_28 = arith.constant 0 : index
    %37 = vector.load %arg6[%c1_26, %c0_27, %c0_28] : memref<3x128x128xbf16, #tpu.memory_space<vmem>>, vector<1x128x128xbf16>
    %38 = vector.shape_cast %37 : vector<1x128x128xbf16> to vector<128x128xbf16>
    %cst_29 = arith.constant dense<0.000000e+00> : vector<16x128xf32>
    %39 = tpu.matmul %36, %38, %cst_29 {dimension_numbers = #tpu.dot_dimension_numbers<[1], [0], [0], [1], [0, 0, 1, 1], [], []>} : vector<16x128xbf16>, vector<128x128xbf16>, vector<16x128xf32> -> vector<16x128xf32>
    %40 = arith.addf %35, %39 : vector<16x128xf32>
    %41 = arith.truncf %31 : vector<16x128xf32> to vector<16x128xbf16>
    %c2_30 = arith.constant 2 : index
    %c0_31 = arith.constant 0 : index
    %c0_32 = arith.constant 0 : index
    %42 = vector.load %arg6[%c2_30, %c0_31, %c0_32] : memref<3x128x128xbf16, #tpu.memory_space<vmem>>, vector<1x128x128xbf16>
    %43 = vector.shape_cast %42 : vector<1x128x128xbf16> to vector<128x128xbf16>
    %cst_33 = arith.constant dense<0.000000e+00> : vector<16x128xf32>
    %44 = tpu.matmul %41, %43, %cst_33 {dimension_numbers = #tpu.dot_dimension_numbers<[1], [0], [0], [1], [0, 0, 1, 1], [], []>} : vector<16x128xbf16>, vector<128x128xbf16>, vector<16x128xf32> -> vector<16x128xf32>
    %45 = arith.addf %40, %44 : vector<16x128xf32>
    %46 = arith.addf %26, %45 : vector<16x128xf32>
    %c0_34 = arith.constant 0 : index
    %c0_35 = arith.constant 0 : index
    %47 = vector.load %arg7[%c0_34, %c0_35] : memref<1x128xf32, #tpu.memory_space<vmem>>, vector<1x128xf32>
    %48 = vector.broadcast %47 : vector<1x128xf32> to vector<16x128xf32>
    %49 = arith.addf %46, %48 : vector<16x128xf32>
    %cst_36 = arith.constant 0.000000e+00 : f32
    %50 = vector.broadcast %cst_36 : f32 to vector<16x128xf32>
    %51 = arith.cmpf ogt, %49, %50 : vector<16x128xf32>
    %c0_37 = arith.constant 0 : index
    %c0_38 = arith.constant 0 : index
    %52 = vector.load %arg10[%c0_37, %c0_38] : memref<1x1xf32, #tpu.memory_space<vmem>>, vector<1x1xf32>
    %53 = vector.broadcast %52 : vector<1x1xf32> to vector<16x128xf32>
    %54 = arith.mulf %53, %49 : vector<16x128xf32>
    %55 = arith.select %51, %49, %54 : vector<16x128xi1>, vector<16x128xf32>
    %cst_39 = arith.constant 0.000000e+00 : f32
    %56 = vector.broadcast %cst_39 : f32 to vector<1x128xf32>
    %57 = vector.extract_strided_slice %55 {offsets = [0, 0], sizes = [15, 128], strides = [1, 1]} : vector<16x128xf32> to vector<15x128xf32>
    %58 = tpu.concatenate %56, %57 in 0 : vector<1x128xf32>, vector<15x128xf32> -> vector<16x128xf32>
    %59 = vector.extract_strided_slice %55 {offsets = [1, 0], sizes = [15, 128], strides = [1, 1]} : vector<16x128xf32> to vector<15x128xf32>
    %60 = tpu.concatenate %59, %56 in 0 : vector<15x128xf32>, vector<1x128xf32> -> vector<16x128xf32>
    %61 = arith.truncf %58 : vector<16x128xf32> to vector<16x128xbf16>
    %c0_40 = arith.constant 0 : index
    %c0_41 = arith.constant 0 : index
    %c0_42 = arith.constant 0 : index
    %62 = vector.load %arg8[%c0_40, %c0_41, %c0_42] : memref<3x128x256xbf16, #tpu.memory_space<vmem>>, vector<1x128x256xbf16>
    %63 = vector.shape_cast %62 : vector<1x128x256xbf16> to vector<128x256xbf16>
    %cst_43 = arith.constant dense<0.000000e+00> : vector<16x256xf32>
    %64 = tpu.matmul %61, %63, %cst_43 {dimension_numbers = #tpu.dot_dimension_numbers<[1], [0], [0], [1], [0, 0, 1, 1], [], []>} : vector<16x128xbf16>, vector<128x256xbf16>, vector<16x256xf32> -> vector<16x256xf32>
    %65 = arith.truncf %55 : vector<16x128xf32> to vector<16x128xbf16>
    %c1_44 = arith.constant 1 : index
    %c0_45 = arith.constant 0 : index
    %c0_46 = arith.constant 0 : index
    %66 = vector.load %arg8[%c1_44, %c0_45, %c0_46] : memref<3x128x256xbf16, #tpu.memory_space<vmem>>, vector<1x128x256xbf16>
    %67 = vector.shape_cast %66 : vector<1x128x256xbf16> to vector<128x256xbf16>
    %cst_47 = arith.constant dense<0.000000e+00> : vector<16x256xf32>
    %68 = tpu.matmul %65, %67, %cst_47 {dimension_numbers = #tpu.dot_dimension_numbers<[1], [0], [0], [1], [0, 0, 1, 1], [], []>} : vector<16x128xbf16>, vector<128x256xbf16>, vector<16x256xf32> -> vector<16x256xf32>
    %69 = arith.addf %64, %68 : vector<16x256xf32>
    %70 = arith.truncf %60 : vector<16x128xf32> to vector<16x128xbf16>
    %c2_48 = arith.constant 2 : index
    %c0_49 = arith.constant 0 : index
    %c0_50 = arith.constant 0 : index
    %71 = vector.load %arg8[%c2_48, %c0_49, %c0_50] : memref<3x128x256xbf16, #tpu.memory_space<vmem>>, vector<1x128x256xbf16>
    %72 = vector.shape_cast %71 : vector<1x128x256xbf16> to vector<128x256xbf16>
    %cst_51 = arith.constant dense<0.000000e+00> : vector<16x256xf32>
    %73 = tpu.matmul %70, %72, %cst_51 {dimension_numbers = #tpu.dot_dimension_numbers<[1], [0], [0], [1], [0, 0, 1, 1], [], []>} : vector<16x128xbf16>, vector<128x256xbf16>, vector<16x256xf32> -> vector<16x256xf32>
    %74 = arith.addf %69, %73 : vector<16x256xf32>
    %c0_52 = arith.constant 0 : index
    %c0_53 = arith.constant 0 : index
    %75 = vector.load %arg9[%c0_52, %c0_53] : memref<1x256xf32, #tpu.memory_space<vmem>>, vector<1x256xf32>
    %76 = vector.broadcast %75 : vector<1x256xf32> to vector<16x256xf32>
    %77 = arith.addf %74, %76 : vector<16x256xf32>
    %cst_54 = arith.constant 0.000000e+00 : f32
    %78 = vector.broadcast %cst_54 : f32 to vector<16x256xf32>
    %79 = arith.cmpf ogt, %77, %78 : vector<16x256xf32>
    %c0_55 = arith.constant 0 : index
    %c0_56 = arith.constant 0 : index
    %80 = vector.load %arg11[%c0_55, %c0_56] : memref<1x1xf32, #tpu.memory_space<vmem>>, vector<1x1xf32>
    %81 = vector.broadcast %80 : vector<1x1xf32> to vector<16x256xf32>
    %82 = arith.mulf %81, %77 : vector<16x256xf32>
    %83 = arith.select %79, %77, %82 : vector<16x256xi1>, vector<16x256xf32>
    %c0_57 = arith.constant 0 : index
    %c0_58 = arith.constant 0 : index
    %c0_59 = arith.constant 0 : index
    %84 = vector.load %arg12[%c0_57, %c0_58, %c0_59] : memref<1x16x256xf32, #tpu.memory_space<vmem>>, vector<1x16x256xf32>
    %85 = vector.shape_cast %84 : vector<1x16x256xf32> to vector<16x256xf32>
    %86 = vector.shape_cast %83 : vector<16x256xf32> to vector<1x16x256xf32>
    tpu.vector_store %arg12[%c0_57, %c0_58, %c0_59], %86 {strides = array<i32>} : memref<1x16x256xf32, #tpu.memory_space<vmem>>, vector<1x16x256xf32>,
    return
  }
  func.func @transform_0(%arg0: i32) -> (i32, i32, i32) {
    %c0_i32 = arith.constant 0 : i32
    %c0_i32_0 = arith.constant 0 : i32
    %c0_i32_1 = arith.constant 0 : i32
    return %arg0, %c0_i32, %c0_i32_0 : i32, i32, i32
  }
  func.func @transform_1(%arg0: i32) -> (i32, i32, i32) {
    %c0_i32 = arith.constant 0 : i32
    %c0_i32_0 = arith.constant 0 : i32
    %c0_i32_1 = arith.constant 0 : i32
    return %arg0, %c0_i32, %c0_i32_0 : i32, i32, i32
  }
  func.func @transform_2(%arg0: i32) -> (i32, i32) {
    %c0_i32 = arith.constant 0 : i32
    %c0_i32_0 = arith.constant 0 : i32
    %c0_i32_1 = arith.constant 0 : i32
    return %c0_i32, %c0_i32_0 : i32, i32
  }
  func.func @transform_3(%arg0: i32) -> (i32, i32) {
    %c0_i32 = arith.constant 0 : i32
    %c0_i32_0 = arith.constant 0 : i32
    %c0_i32_1 = arith.constant 0 : i32
    return %c0_i32, %c0_i32_0 : i32, i32
  }
  func.func @transform_4(%arg0: i32) -> (i32, i32, i32) {
    %c0_i32 = arith.constant 0 : i32
    %c0_i32_0 = arith.constant 0 : i32
    %c0_i32_1 = arith.constant 0 : i32
    %c0_i32_2 = arith.constant 0 : i32
    return %c0_i32, %c0_i32_0, %c0_i32_1 : i32, i32, i32
  }
  func.func @transform_5(%arg0: i32) -> (i32, i32, i32) {
    %c0_i32 = arith.constant 0 : i32
    %c0_i32_0 = arith.constant 0 : i32
    %c0_i32_1 = arith.constant 0 : i32
    %c0_i32_2 = arith.constant 0 : i32
    return %c0_i32, %c0_i32_0, %c0_i32_1 : i32, i32, i32
  }
  func.func @transform_6(%arg0: i32) -> (i32, i32) {
    %c0_i32 = arith.constant 0 : i32
    %c0_i32_0 = arith.constant 0 : i32
    %c0_i32_1 = arith.constant 0 : i32
    return %c0_i32, %c0_i32_0 : i32, i32
  }
  func.func @transform_7(%arg0: i32) -> (i32, i32, i32) {
    %c0_i32 = arith.constant 0 : i32
    %c0_i32_0 = arith.constant 0 : i32
    %c0_i32_1 = arith.constant 0 : i32
    %c0_i32_2 = arith.constant 0 : i32
    return %c0_i32, %c0_i32_0, %c0_i32_1 : i32, i32, i32
  }
  func.func @transform_8(%arg0: i32) -> (i32, i32) {
    %c0_i32 = arith.constant 0 : i32
    %c0_i32_0 = arith.constant 0 : i32
    %c0_i32_1 = arith.constant 0 : i32
    return %c0_i32, %c0_i32_0 : i32, i32
  }
  func.func @transform_9(%arg0: i32) -> (i32, i32) {
    %c0_i32 = arith.constant 0 : i32
    %c0_i32_0 = arith.constant 0 : i32
    %c0_i32_1 = arith.constant 0 : i32
    return %c0_i32, %c0_i32_0 : i32, i32
  }
  func.func @transform_10(%arg0: i32) -> (i32, i32) {
    %c0_i32 = arith.constant 0 : i32
    %c0_i32_0 = arith.constant 0 : i32
    %c0_i32_1 = arith.constant 0 : i32
    return %c0_i32, %c0_i32_0 : i32, i32
  }
  func.func @transform_11(%arg0: i32) -> (i32, i32, i32) {
    %c0_i32 = arith.constant 0 : i32
    %c0_i32_0 = arith.constant 0 : i32
    %c0_i32_1 = arith.constant 0 : i32
    return %arg0, %c0_i32, %c0_i32_0 : i32, i32, i32
  }
}

</mosaic_0001>

<bundles_post_ra>
// kernel: tile.18
= control target key start
LH: loop header
LB: loop body
LE: loop exit
PB: predicated region body
PF: predicated region fallthrough
CT: control target
= control target key end

     0   :  { %s28_s0 = inlined_call_operand.vmem [shape: f32[16], index: 0, kind: input, shape index: {}]   ;;  %s29_s1 = inlined_call_operand.vmem [shape: f32[16,16], index: 1, kind: output, shape index: {}]  }
   0x1   :  { %v4_v0 = vld [vmem:[%s28_s0] ss:$0 sm:$0xff] }
   0x2   :  { %5 = vst [vmem:[%s29_s1] sm:$0xff] %v4_v0  ;;  %8 = vst [vmem:[%s29_s1 + $0x8] sm:$0xff] %v4_v0 }

// kernel: tile.19
= control target key start
LH: loop header
LB: loop body
LE: loop exit
PB: predicated region body
PF: predicated region fallthrough
CT: control target
= control target key end

     0   :  { %s7_s6 = smov 3  ;;  %s21_s9 = smov 3  ;;  %vm4_vm0 = vcmask 130048   ;;  %vm11_vm1 = vcmask 1048448   ;;  %vm18_vm2 = vcmask 917248   ;;  %vm25_vm3 = vcmask 786048   ;;  %s128_s0 = inlined_call_operand.vmem [shape: f32[16,16], index: 0, kind: input, shape index: {}]   ;;  %s129_s1 = inlined_call_operand.vmem [shape: f32[1,256], index: 1, kind: output, shape index: {}]  }
   0x1   :  { %v66_v0 = vld [vmem:[%s128_s0 + $0x7] ss:$8 sm:%s7_s6]   ;;  %s81_s10 = smov 112   ;;  %v68_v1 = vld [vmem:[%s128_s0 + $0x5] ss:$8 sm:%s21_s9]   ;;  %s14_s13 = smov 3 }
   0x2   :  { %9 = vrot.lane.b32.xlu0 %v66_v0, %s81_s10  ;;  %s82_s14 = smov 80   ;;  %v67_v2 = vld [vmem:[%s128_s0 + $0x6] ss:$8 sm:%s14_s13]   ;;  %s28_s17 = smov 3  ;;  %vm32_vm4 = vcmask 654848   ;;  %vm39_vm5 = vcmask 523648  }
   0x3   :  { %23 = vrot.lane.b32.xlu1 %v68_v1, %s82_s14  ;;  %v69_v3 = vld [vmem:[%s128_s0 + $0x4] ss:$8 sm:%s28_s17]   ;;  %s35_s20 = smov 3  ;;  %s42_s21 = smov 3  ;;  %vm46_vm6 = vcmask 392448   ;;  %vm53_vm7 = vcmask 261248  }
   0x4   :  { %s83_s22 = smov 96   ;;  %s84_s23 = smov 64   ;;  %v70_v4 = vld [vmem:[%s128_s0 + $0x3] ss:$8 sm:%s35_s20]   ;;  %v71_v5 = vld [vmem:[%s128_s0 + $0x2] ss:$8 sm:%s42_s21]  }
   0x5   :  { %s2_s26 = smov 3  ;;  %s49_s29 = smov 3 }
   0x6   :  { %16 = vrot.lane.b32.xlu0 %v67_v2, %s83_s22  ;;  %v3_v6 = vld [vmem:[%s128_s0] ss:$8 sm:%s2_s26]   ;;  %s85_s3 = smov 48   ;;  %s86_s4 = smov 32  }
   0x7   :  { %30 = vrot.lane.b32.xlu1 %v69_v3, %s84_s23  ;;  %5 = vst.msk [vmem:[#allocation0] ss:$8 sm:$0x3] %vm4_vm0, %v3_v6   ;;  %v72_v7 = vld [vmem:[%s128_s0 + $0x1] ss:$8 sm:%s49_s29]   ;;  %s87_s0 = smov 16  }
   0xa   :  { %37 = vrot.lane.b32.xlu0 %v70_v4, %s85_s3 }
   0xb   :  { %44 = vrot.lane.b32.xlu1 %v71_v5, %s86_s4 }
   0xe   :  { %51 = vrot.lane.b32.xlu0 %v72_v7, %s87_s0 }
  0x74   :  { %v10_v8 = vpop.permute.xlu0 %9  }
  0x75   :  { %12 = vst.msk [vmem:[#allocation0] ss:$8 sm:$0x3] %vm11_vm1, %v10_v8   ;;  %v24_v9 = vpop.permute.xlu1 %23  }
  0x78   :  { %v17_v10 = vpop.permute.xlu0 %16  }
  0x79   :  { %19 = vst.msk [vmem:[#allocation0] ss:$8 sm:$0x3] %vm18_vm2, %v17_v10   ;;  %v31_v11 = vpop.permute.xlu1 %30  }
  0x7a   :  { %26 = vst.msk [vmem:[#allocation0] ss:$8 sm:$0x3] %vm25_vm3, %v24_v9  }
  0x7b   :  { %33 = vst.msk [vmem:[#allocation0] ss:$8 sm:$0x3] %vm32_vm4, %v31_v11  }
  0x7c   :  { %v38_v12 = vpop.permute.xlu0 %37  }
  0x7d   :  { %40 = vst.msk [vmem:[#allocation0] ss:$8 sm:$0x3] %vm39_vm5, %v38_v12   ;;  %v45_v13 = vpop.permute.xlu1 %44  }
  0x7e   :  { %47 = vst.msk [vmem:[#allocation0] ss:$8 sm:$0x3] %vm46_vm6, %v45_v13  }
  0x80   :  { %v52_v14 = vpop.permute.xlu0 %51  }
  0x81   :  { %54 = vst.msk [vmem:[#allocation0] ss:$8 sm:$0x3] %vm53_vm7, %v52_v14  }
  0x88   :  { %v58_v15 = vld [vmem:[#allocation0] sm:$0x1]  ;;  %v62_v16 = vld [vmem:[#allocation0 + $0x8] sm:$0x1] }
  0x89   :  { %60 = vst [vmem:[%s129_s1] sm:$0x1] %v58_v15  ;;  %73 = vst [vmem:[%s129_s1 + $0x1] sm:$0x1] %v62_v16 }

// kernel: tile.13
= control target key start
LH: loop header
LB: loop body
LE: loop exit
PB: predicated region body
PF: predicated region fallthrough
CT: control target
= control target key end

     0   :  { %s28_s0 = inlined_call_operand.vmem [shape: f32[8], index: 0, kind: input, shape index: {}]   ;;  %s29_s1 = inlined_call_operand.vmem [shape: f32[16,8], index: 1, kind: output, shape index: {}]  }
   0x1   :  { %v4_v0 = vld [vmem:[%s28_s0] ss:$0 sm:$0xff] }
   0x2   :  { %5 = vst [vmem:[%s29_s1] sm:$0xff] %v4_v0  ;;  %8 = vst [vmem:[%s29_s1 + $0x8] sm:$0xff] %v4_v0 }

// kernel: tile.14
= control target key start
LH: loop header
LB: loop body
LE: loop exit
PB: predicated region body
PF: predicated region fallthrough
CT: control target
= control target key end

     0   :  { %s131_s10 = smov 120   ;;  %s132_s11 = smov 104   ;;  %vm3_vm0 = vcmask 64512   ;;  %vm9_vm1 = vcmask 1048512   ;;  %vm15_vm2 = vcmask 982912   ;;  %vm21_vm3 = vcmask 917312   ;;  %s207_s0 = inlined_call_operand.vmem [shape: f32[16,8], index: 0, kind: input, shape index: {}]   ;;  %s208_s1 = inlined_call_operand.vmem [shape: f32[1,128], index: 1, kind: output, shape index: {}]  }
   0x1   :  { %v101_v0 = vld [vmem:[%s207_s0 + $0xf] sm:$0x1]   ;;  %v103_v1 = vld [vmem:[%s207_s0 + $0xd] sm:$0x1]   ;;  %v102_v2 = vld [vmem:[%s207_s0 + $0xe] sm:$0x1]  }
   0x2   :  { %7 = vrot.lane.b32.xlu0 %v101_v0, %s131_s10  ;;  %19 = vrot.lane.b32.xlu1 %v103_v1, %s132_s11  ;;  %v104_v3 = vld [vmem:[%s207_s0 + $0xc] sm:$0x1]   ;;  %s133_s16 = smov 112   ;;  %s134_s17 = smov 96   ;;  %v105_v4 = vld [vmem:[%s207_s0 + $0xb] sm:$0x1]  }
   0x3   :  { %v106_v5 = vld [vmem:[%s207_s0 + $0xa] sm:$0x1]   ;;  %v2_v6 = vld [vmem:[%s207_s0] sm:$0x1]   ;;  %s135_s24 = smov 88   ;;  %s136_s25 = smov 80  }
   0x4   :  { %4 = vst.msk [vmem:[#allocation0] sm:$0x1] %vm3_vm0, %v2_v6   ;;  %v107_v7 = vld [vmem:[%s207_s0 + $0x9] sm:$0x1]   ;;  %v108_v8 = vld [vmem:[%s207_s0 + $0x8] sm:$0x1]  }
   0x5   :  { %s137_s30 = smov 72   ;;  %s138_s2 = smov 64   ;;  %v109_v9 = vld [vmem:[%s207_s0 + $0x7] sm:$0x1]   ;;  %v110_v10 = vld [vmem:[%s207_s0 + $0x6] sm:$0x1]  }
   0x6   :  { %13 = vrot.lane.b32.xlu0 %v102_v2, %s133_s16  ;;  %25 = vrot.lane.b32.xlu1 %v104_v3, %s134_s17  ;;  %s139_s7 = smov 56   ;;  %s140_s8 = smov 48   ;;  %v111_v11 = vld [vmem:[%s207_s0 + $0x5] sm:$0x1]   ;;  %v112_v12 = vld [vmem:[%s207_s0 + $0x4] sm:$0x1]  }
   0x7   :  { %s141_s13 = smov 40   ;;  %s142_s14 = smov 32   ;;  %v113_v13 = vld [vmem:[%s207_s0 + $0x3] sm:$0x1]   ;;  %v114_v14 = vld [vmem:[%s207_s0 + $0x2] sm:$0x1]  }
   0x8   :  { %s143_s19 = smov 24   ;;  %s144_s20 = smov 16   ;;  %v115_v15 = vld [vmem:[%s207_s0 + $0x1] sm:$0x1]   ;;  %vm27_vm4 = vcmask 851712   ;;  %vm33_vm5 = vcmask 786112  }
   0x9   :  { %s145_s0 = smov 8   ;;  %vm39_vm6 = vcmask 720512   ;;  %vm45_vm7 = vcmask 654912   ;;  %vm51_vm8 = vcmask 589312   ;;  %vm57_vm9 = vcmask 523712  }
   0xa   :  { %31 = vrot.lane.b32.xlu0 %v105_v4, %s135_s24  ;;  %37 = vrot.lane.b32.xlu1 %v106_v5, %s136_s25  ;;  %vm63_vm10 = vcmask 458112   ;;  %vm69_vm11 = vcmask 392512   ;;  %vm75_vm12 = vcmask 326912   ;;  %vm81_vm13 = vcmask 261312  }
   0xb   :  { %vm87_vm14 = vcmask 195712   ;;  %vm93_vm15 = vcmask 130112  }
   0xe   :  { %43 = vrot.lane.b32.xlu0 %v107_v7, %s137_s30  ;;  %49 = vrot.lane.b32.xlu1 %v108_v8, %s138_s2 }
  0x12   :  { %55 = vrot.lane.b32.xlu0 %v109_v9, %s139_s7  ;;  %61 = vrot.lane.b32.xlu1 %v110_v10, %s140_s8 }
  0x16   :  { %67 = vrot.lane.b32.xlu0 %v111_v11, %s141_s13  ;;  %73 = vrot.lane.b32.xlu1 %v112_v12, %s142_s14 }
  0x1a   :  { %79 = vrot.lane.b32.xlu0 %v113_v13, %s143_s19  ;;  %85 = vrot.lane.b32.xlu1 %v114_v14, %s144_s20 }
  0x1e   :  { %91 = vrot.lane.b32.xlu0 %v115_v15, %s145_s0 }
  0x74   :  { %v8_v16 = vpop.permute.xlu0 %7   ;;  %v20_v17 = vpop.permute.xlu1 %19  }
  0x75   :  { %10 = vst.msk [vmem:[#allocation0] sm:$0x1] %vm9_vm1, %v8_v16  }
  0x78   :  { %v14_v18 = vpop.permute.xlu0 %13   ;;  %v26_v19 = vpop.permute.xlu1 %25  }
  0x79   :  { %16 = vst.msk [vmem:[#allocation0] sm:$0x1] %vm15_vm2, %v14_v18  }
  0x7a   :  { %22 = vst.msk [vmem:[#allocation0] sm:$0x1] %vm21_vm3, %v20_v17  }
  0x7b   :  { %28 = vst.msk [vmem:[#allocation0] sm:$0x1] %vm27_vm4, %v26_v19  }
  0x7c   :  { %v32_v20 = vpop.permute.xlu0 %31   ;;  %v38_v21 = vpop.permute.xlu1 %37  }
  0x7d   :  { %34 = vst.msk [vmem:[#allocation0] sm:$0x1] %vm33_vm5, %v32_v20  }
  0x7e   :  { %40 = vst.msk [vmem:[#allocation0] sm:$0x1] %vm39_vm6, %v38_v21  }
  0x80   :  { %v44_v22 = vpop.permute.xlu0 %43   ;;  %v50_v23 = vpop.permute.xlu1 %49  }
  0x81   :  { %46 = vst.msk [vmem:[#allocation0] sm:$0x1] %vm45_vm7, %v44_v22  }
  0x82   :  { %52 = vst.msk [vmem:[#allocation0] sm:$0x1] %vm51_vm8, %v50_v23  }
  0x84   :  { %v56_v24 = vpop.permute.xlu0 %55   ;;  %v62_v25 = vpop.permute.xlu1 %61  }
  0x85   :  { %58 = vst.msk [vmem:[#allocation0] sm:$0x1] %vm57_vm9, %v56_v24  }
  0x86   :  { %64 = vst.msk [vmem:[#allocation0] sm:$0x1] %vm63_vm10, %v62_v25  }
  0x88   :  { %v68_v26 = vpop.permute.xlu0 %67   ;;  %v74_v27 = vpop.permute.xlu1 %73  }
  0x89   :  { %70 = vst.msk [vmem:[#allocation0] sm:$0x1] %vm69_vm11, %v68_v26  }
  0x8a   :  { %76 = vst.msk [vmem:[#allocation0] sm:$0x1] %vm75_vm12, %v74_v27  }
  0x8c   :  { %v80_v28 = vpop.permute.xlu0 %79   ;;  %v86_v29 = vpop.permute.xlu1 %85  }
  0x8d   :  { %82 = vst.msk [vmem:[#allocation0] sm:$0x1] %vm81_vm13, %v80_v28  }
  0x8e   :  { %88 = vst.msk [vmem:[#allocation0] sm:$0x1] %vm87_vm14, %v86_v29  }
  0x90   :  { %v92_v30 = vpop.permute.xlu0 %91  }
  0x91   :  { %94 = vst.msk [vmem:[#allocation0] sm:$0x1] %vm93_vm15, %v92_v30  }
  0x98   :  { %v98_v31 = vld [vmem:[#allocation0] sm:$0x1] }
  0x99   :  { %100 = vst [vmem:[%s208_s1] sm:$0x1] %v98_v31 }

// kernel: up_forward.1
= control target key start
LH: loop header
LB: loop body
LE: loop exit
PB: predicated region body
PF: predicated region fallthrough
CT: control target
= control target key end

     0   :  { %s2516_s21 = smov 0   ;;  %s2980_s0 = inlined_call_operand.vmem [shape: f32[2,8,64], index: 0, kind: input, shape index: {}]   ;;  %s2981_s1 = inlined_call_operand.vmem [shape: f32[2,16,128], index: 1, kind: input, shape index: {}]   ;;  %s2982_s2 = inlined_call_operand.vmem [shape: f32[16,8], index: 2, kind: input, shape index: {}]   ;;  %s2983_s3 = inlined_call_operand.vmem [shape: f32[64,128], index: 3, kind: input, shape index: {}]   ;;  %s2984_s4 = inlined_call_operand.vmem [shape: bf16[3,128,128], index: 4, kind: input, shape index: {}]   ;;  %s2985_s5 = inlined_call_operand.vmem [shape: bf16[3,128,128], index: 5, kind: input, shape index: {}]   ;;  %s2986_s6 = inlined_call_operand.vmem [shape: f32[1,128], index: 6, kind: input, shape index: {}]   ;;  %s2987_s7 = inlined_call_operand.vmem [shape: bf16[3,128,256], index: 7, kind: input, shape index: {}]   ;;  %s2988_s8 = inlined_call_operand.vmem [shape: f32[1,256], index: 8, kind: input, shape index: {}]   ;;  %s2989_s9 = inlined_call_operand.<no memory space> [shape: f32[1,1], index: 9, kind: input, shape index: {}]   ;;  %s2990_s11 = inlined_call_operand.vmem [shape: f32[2,16,256], index: 11, kind: output, shape index: {}]   ;;  %s2991_s10 = inlined_call_operand.<no memory space> [shape: f32[1,1], index: 10, kind: input, shape index: {}]  }
   0x1   :  { %v16_v0 = vstv %s2989_s9  ;;  %v18_v1 = vstv %s2991_s10 }
   0x2   :  { %17 = vst [vmem:[#allocation2] sm:$0x1] %v16_v0  ;;  %19 = vst [vmem:[#allocation3] sm:$0x1] %v18_v1 }
   0x3 LB: > { %s1836_s22 = sadd.s32 4294967295, %s2444_s21   ;;  %p1840_p0 = scmp.ge.s32.totalorder %s2444_s21, 1  ;;  %s2444_s21 = sphi %s2516_s21, %s25_s21  }
   0x4   : > { %p350_p1 = scmp.lt.s32.totalorder %s2444_s21, 3 }
   0x6   : > { %p351_p2 = pnand %p1840_p0, %p350_p1 }
   0x7   : > { %p394_p3 = scmp.lt.s32.totalorder (!%p351_p2), %s1836_s22, 1  ;;  %v412_v2 = vld [vmem:[%s2982_s2] sm:$0xff] (!%p351_p2)  ;;  %vm414_vm0 = vcmask (!%p351_p2), 64512   ;;  %v497_v4 = vld [vmem:[%s2983_s3 + $0x8] sm:$0xff] (!%p351_p2)  ;;  %v498_v5 = vld [vmem:[%s2983_s3 + $0x10] sm:$0xff] (!%p351_p2)  ;;  %v2446_v17 = vmov (!%p351_p2), 0.0  }
   0x8   : > { %354 = sbr.rel (%p351_p2) target bundleno = 992 (0x3e0), region = 64  ;;  %2139 = vmatprep.mubr.msk.f32.mxu1 (!%p351_p2), %vm414_vm0, %v412_v2  ;;  %v496_v3 = vld [vmem:[%s2983_s3] sm:$0xff] (!%p351_p2)  ;;  %v413_v6 = vld [vmem:[%s2982_s2 + $0x8] sm:$0xff] (!%p351_p2)  ;;  %v499_v7 = vld [vmem:[%s2983_s3 + $0x18] sm:$0xff] (!%p351_p2)  ;;  %2201 = vmatprep.subr.bf16.mxu0 (!%p351_p2), %v2446_v17  ;;  %vm2447_vm1 = vmmov (!%p351_p2), 0   ;;  %vm588_vm2 = vcmask (!%p351_p2), 1040384  }
   0x9   : > { %v2281_v8 = vpack.c.bf16 (!%p351_p2), %v497_v4, %v496_v3  ;;  %v500_v10 = vld [vmem:[%s2983_s3 + $0x20] sm:$0xff] (!%p351_p2)  ;;  %v501_v11 = vld [vmem:[%s2983_s3 + $0x28] sm:$0xff] (!%p351_p2)  ;;  %v2285_v12 = vpack.c.bf16 (!%p351_p2), %v499_v7, %v498_v5  ;;  %v502_v13 = vld [vmem:[%s2983_s3 + $0x30] sm:$0xff] (!%p351_p2)  ;;  %2217 = vmatprep.mubr.msk.bf16.mxu0 (!%p351_p2), %vm2447_vm1, %v2446_v17  ;;  %vm595_vm3 = vcmask (!%p351_p2), 1046528   ;;  %vm2448_vm4 = vmmov (!%p351_p2), 1  }
   0xa   : > { %v503_v14 = vld [vmem:[%s2983_s3 + $0x38] sm:$0xff] (!%p351_p2)  ;;  %v2289_v15 = vpack.c.bf16 (!%p351_p2), %v501_v11, %v500_v10  ;;  %v2327_v21 = vld [vmem:[%s2984_s4 + $0x80] sm:$0xff] (!%p351_p2)   ;;  %v2329_v22 = vld [vmem:[%s2984_s4 + $0x88] sm:$0xff] (!%p351_p2)   ;;  %vm504_vm6 = vcmask (!%p351_p2), 523264   ;;  %v2449_v10 = vmov (!%p351_p2), 0  }
   0xb   : > { %v2293_v16 = vpack.c.bf16 (!%p351_p2), %v503_v14, %v502_v13  ;;  %2202 = vmatpush3.bf16.msra.mxu0 (!%p351_p2), %v2327_v21  ;;  %v2331_v23 = vld [vmem:[%s2984_s4 + $0x90] sm:$0xff] (!%p351_p2)   ;;  %v2333_v24 = vld [vmem:[%s2984_s4 + $0x98] sm:$0xff] (!%p351_p2)   ;;  %v2335_v25 = vld [vmem:[%s2984_s4 + $0xa0] sm:$0xff] (!%p351_p2)   ;;  %2317 = vset.pattern.permute.xlu0 (!%p351_p2), %v2449_v10 }
   0xc   : > { %2203 = vmatprep.subr.bf16.mxu0 (!%p351_p2), %v2446_v17  ;;  %v2337_v26 = vld [vmem:[%s2984_s4 + $0xa8] sm:$0xff] (!%p351_p2)   ;;  %v2339_v27 = vld [vmem:[%s2984_s4 + $0xb0] sm:$0xff] (!%p351_p2)   ;;  %v2341_v30 = vld [vmem:[%s2984_s4 + $0xb8] sm:$0xff] (!%p351_p2)  }
   0xd   : > { %vm2618_vm5 = vmpackc.low (!%p351_p2), %vm595_vm3, %vm2448_vm4  ;;  %v2344_v38 = vld [vmem:[%s2985_s5] sm:$0xff] (!%p351_p2)   ;;  %v2346_v39 = vld [vmem:[%s2985_s5 + $0x8] sm:$0xff] (!%p351_p2)  }
   0xe   : > { %v2348_v40 = vld [vmem:[%s2985_s5 + $0x10] sm:$0xff] (!%p351_p2)   ;;  %v2350_v41 = vld [vmem:[%s2985_s5 + $0x18] sm:$0xff] (!%p351_p2)   ;;  %v2352_v42 = vld [vmem:[%s2985_s5 + $0x20] sm:$0xff] (!%p351_p2)  }
   0xf   : > { %s2997_s22 = smov (!%p394_p3, %s1836_s22), 1  ;;  %2204 = vmatpush3.bf16.msra.mxu0 %v2329_v22  ;;  %v2354_v43 = vld [vmem:[%s2985_s5 + $0x28] sm:$0xff]   ;;  %v2318_v45 = vld [vmem:[%s2984_s4 + $0x40] sm:$0xff]   ;;  %v2320_v48 = vld [vmem:[%s2984_s4 + $0x50] sm:$0xff]  }
  0x10   : > { %s1841_s29 = sshll.u32 %s2997_s22, 3  ;;  %s2068_s26 = sshll.u32 %s2997_s22, 4  ;;  %2205 = vmatprep.subr.bf16.mxu0 %v2446_v17  ;;  %v2319_v47 = vld [vmem:[%s2984_s4 + $0x48] sm:$0xff]   ;;  %v2321_v49 = vld [vmem:[%s2984_s4 + $0x58] sm:$0xff]   ;;  %v2322_v50 = vld [vmem:[%s2984_s4 + $0x60] sm:$0xff]  }
  0x11   : > { %s397_s17 = scalar_lea.vmem %s2980_s0, %s1841_s29  ;;  %s402_s29 = scalar_lea.vmem %s2981_s1, %s2068_s26  ;;  %v2323_v51 = vld [vmem:[%s2984_s4 + $0x68] sm:$0xff]   ;;  %v2324_v52 = vld [vmem:[%s2984_s4 + $0x70] sm:$0xff]   ;;  %v2325_v53 = vld [vmem:[%s2984_s4 + $0x78] sm:$0xff]  }
  0x12   : > { %v409_v9 = vld [vmem:[%s397_s17] sm:$0xff]  ;;  %v2570_v19 = vld [vmem:[%s402_s29 + $0x8] sm:$0xff]  ;;  %v2330_v56 = vld [vmem:[%s2984_s4 + $0x10] sm:$0xff]   ;;  %s2069_s17 = sshll.u32 %s2997_s22, 5 }
  0x13   : > { %2137 = vmatprep.subr.mxu1 %v409_v9  ;;  %v2568_v18 = vld [vmem:[%s402_s29] sm:$0xff]  ;;  %2206 = vmatpush3.bf16.msra.mxu0 %v2331_v23  ;;  %v590_v29 = vrot.slane %v2570_v19, 7  ;;  %v597_v34 = vrot.slane %v2570_v19, 1  ;;  %v2328_v55 = vld [vmem:[%s2984_s4 + $0x8] sm:$0xff]   ;;  %v2332_v57 = vld [vmem:[%s2984_s4 + $0x18] sm:$0xff]   ;;  %s407_s20 = scalar_lea.vmem %s2990_s11, %s2069_s17 }
  0x14   : > { %2138 = vmatpush3.msra.mxu1 %v409_v9  ;;  %v619_v20 = vpack.c.bf16 %v2570_v19, %v2568_v18  ;;  %2207 = vmatprep.subr.bf16.mxu0 %v2446_v17  ;;  %v589_v28 = vrot.slane %v2568_v18, 7  ;;  %v596_v31 = vrot.slane %v2568_v18, 1  ;;  %v2326_v54 = vld [vmem:[%s2984_s4] sm:$0xff]   ;;  %v2336_v59 = vld [vmem:[%s2984_s4 + $0x28] sm:$0xff]   ;;  %v2338_v60 = vld [vmem:[%s2984_s4 + $0x30] sm:$0xff]  }
  0x15   : > { %2140 = vmatmul.mubr.msk.f32.vlgmr.msra.gmra.mrb[0].mxu1 %vm414_vm0, %v413_v6  ;;  %2282 = vmatprep.subr.bf16.mxu1 %v2281_v8  ;;  %v2334_v58 = vld [vmem:[%s2984_s4 + $0x20] sm:$0xff]   ;;  %v2340_v61 = vld [vmem:[%s2984_s4 + $0x38] sm:$0xff]   ;;  %vm1882_vm7 = vmneg %vm588_vm2 }
  0x16   : > { %2284 = vmatpush3.bf16.msra.mxu1 %v2281_v8  ;;  %v591_v32 = vsel %vm588_vm2, %v589_v28, %v590_v29  ;;  %v598_v35 = vsel %vm595_vm3, %v596_v31, %v597_v34  ;;  %vm2722_vm8 = vmpackc.low %vm2448_vm4, %vm1882_vm7  ;;  %v2342_v63 = vld [vmem:[%s2985_s5 + $0x40] sm:$0xff]   ;;  %v2343_v0 = vld [vmem:[%s2985_s5 + $0x48] sm:$0xff]  }
  0x17   : > { %2286 = vmatprep.subr.bf16.mxu1 %v2285_v12  ;;  %2208 = vmatpush3.bf16.msra.mxu0 %v2333_v24  ;;  %v2611_v33 = vpack.c.bf16 %v591_v32, %v589_v28  ;;  %v1911_v37 = vpack.c.bf16 %v597_v34, %v598_v35  ;;  %v2345_v1 = vld [vmem:[%s2985_s5 + $0x50] sm:$0xff]   ;;  %v2347_v2 = vld [vmem:[%s2985_s5 + $0x58] sm:$0xff]   ;;  %v2349_v3 = vld [vmem:[%s2985_s5 + $0x60] sm:$0xff]  }
  0x18   : > { %2209 = vmatprep.subr.bf16.mxu0 %v2446_v17  ;;  %v2351_v4 = vld [vmem:[%s2985_s5 + $0x68] sm:$0xff]   ;;  %v2356_v5 = vld [vmem:[%s2985_s5 + $0x30] sm:$0xff]   ;;  %v2357_v7 = vld [vmem:[%s2985_s5 + $0x38] sm:$0xff]  }
  0x19   : > { %v2353_v6 = vld [vmem:[%s2985_s5 + $0x70] sm:$0xff]   ;;  %v2355_v8 = vld [vmem:[%s2985_s5 + $0x78] sm:$0xff]   ;;  %v1977_v9 = vld [vmem:[#allocation2] ss:$0 sm:$0xff] }
  0x1a   : > { %2288 = vmatpush3.bf16.msra.mxu1 %v2285_v12  ;;  %1280 = vperm.xlu0 %2317, %v1977_v9   ;;  %v2065_v11 = vld [vmem:[#allocation3] ss:$0 sm:$0xff]  ;;  %v2359_v29 = vld [vmem:[%s2985_s5 + $0x88] sm:$0xff]   ;;  %v2361_v31 = vld [vmem:[%s2985_s5 + $0x98] sm:$0xff]  }
  0x1b   : > { %2290 = vmatprep.subr.bf16.mxu1 %v2289_v15  ;;  %2210 = vmatpush3.bf16.msra.mxu0 %v2335_v25  ;;  %v2358_v21 = vld [vmem:[%s2985_s5 + $0x80] sm:$0xff]   ;;  %v2364_v34 = vld [vmem:[%s2985_s5 + $0xb0] sm:$0xff]   ;;  %v2365_v35 = vld [vmem:[%s2985_s5 + $0xb8] sm:$0xff]  }
  0x1c   : > { %2211 = vmatprep.subr.bf16.mxu0 %v2446_v17  ;;  %v2362_v32 = vld [vmem:[%s2985_s5 + $0xa0] sm:$0xff]   ;;  %v2425_v62 = vld [vmem:[%s2987_s7 + $0x134] ss:$8 sps:$4 sm:$0xff]  }
  0x1e   : > { %2292 = vmatpush3.bf16.msra.mxu1 %v2289_v15  ;;  %1754 = vperm.xlu0 %2317, %v2065_v11  }
  0x1f   : > { %2294 = vmatprep.subr.bf16.mxu1 %v2293_v16  ;;  %2212 = vmatpush3.bf16.msra.mxu0 %v2337_v26 }
  0x20   : > { %2213 = vmatprep.subr.bf16.mxu0 %v2446_v17 }
  0x22   : > { %2296 = vmatpush3.bf16.msra.mxu1 %v2293_v16 }
  0x23   : > { %2161 = vmatprep.subr.bf16.mxu1 %v2446_v17  ;;  %2214 = vmatpush3.bf16.msra.mxu0 %v2339_v27 }
  0x24   : > { %2215 = vmatprep.subr.bf16.mxu0 %v2446_v17 }
  0x27   : > { %2216 = vmatpush3.bf16.msra.mxu0 %v2341_v30  ;;  %v2360_v30 = vld [vmem:[%s2985_s5 + $0x90] sm:$0xff]  }
  0x28   : > { %2241 = vmatprep.subr.bf16.mxu0 %v2446_v17 }
  0x2a   : > { %2218 = vmatmul.mubr.msk.bf16.vlgmr.msra.gmra.mrb[0].mxu0 %vm2618_vm5, %v1911_v37 }
  0x2b   : > { %2257 = vmatprep.mubr.msk.bf16.mxu0 %vm2447_vm1, %v2446_v17  ;;  %2242 = vmatpush3.bf16.msra.mxu0 %v2344_v38 }
  0x2c   : > { %2243 = vmatprep.subr.bf16.mxu0 %v2446_v17 }
  0x2f   : > { %2244 = vmatpush3.bf16.msra.mxu0 %v2346_v39 }
  0x30   : > { %2245 = vmatprep.subr.bf16.mxu0 %v2446_v17 }
  0x33   : > { %2246 = vmatpush3.bf16.msra.mxu0 %v2348_v40 }
  0x34   : > { %2247 = vmatprep.subr.bf16.mxu0 %v2446_v17 }
  0x37   : > { %2248 = vmatpush3.bf16.msra.mxu0 %v2350_v41 }
  0x38   : > { %2249 = vmatprep.subr.bf16.mxu0 %v2446_v17 }
  0x3b   : > { %2250 = vmatpush3.bf16.msra.mxu0 %v2352_v42 }
  0x3c   : > { %2251 = vmatprep.subr.bf16.mxu0 %v2446_v17 }
  0x3f   : > { %2252 = vmatpush3.bf16.msra.mxu0 %v2354_v43 }
  0x40   : > { %2253 = vmatprep.subr.bf16.mxu0 %v2446_v17 }
  0x43   : > { %2254 = vmatpush3.bf16.msra.mxu0 %v2356_v5 }
  0x44   : > { %2255 = vmatprep.subr.bf16.mxu0 %v2446_v17 }
  0x47   : > { %2256 = vmatpush3.bf16.msra.mxu0 %v2357_v7 }
  0xe8   : > { %v2141_v44 = vpop.f32.mrb[0].mxu1 }
  0xe9   : > { %v487_v46 = vpop.f32.mrb[1].mxu1 }
  0xea   : > { %2158 = vmatprep.mubr.msk.f32.mxu1 %vm504_vm6, %v487_v46 }
  0xeb   : > { %2159 = vmatmul.mubr.msk.f32.vlgmr.msra.gmra.mrb[2].mxu1 %vm504_vm6, %v2141_v44 }
  0xec   : > { %2162 = vmatpush3.bf16.msra.mxu1 %v2318_v45  ;;  %2177 = vmatprep.mubr.msk.bf16.mxu1 %vm2447_vm1, %v2446_v17 }
  0xed   : > { %2163 = vmatprep.subr.bf16.mxu1 %v2446_v17 }
  0xf0   : > { %2164 = vmatpush3.bf16.msra.mxu1 %v2319_v47 }
  0xf1   : > { %2165 = vmatprep.subr.bf16.mxu1 %v2446_v17 }
  0xf4   : > { %2166 = vmatpush3.bf16.msra.mxu1 %v2320_v48 }
  0xf5   : > { %2167 = vmatprep.subr.bf16.mxu1 %v2446_v17 }
  0xf8   : > { %2168 = vmatpush3.bf16.msra.mxu1 %v2321_v49  ;;  %v2368_v49 = vld [vmem:[%s2987_s7 + $0x84] ss:$8 sps:$4 sm:$0xff]  }
  0xf9   : > { %2169 = vmatprep.subr.bf16.mxu1 %v2446_v17  ;;  %1416 = vmatprep.subr.bf16.mxu0 %v2368_v49  ;;  %v2405_v49 = vld [vmem:[%s2987_s7 + $0x50] ss:$8 sps:$4 sm:$0xff]  }
  0xfc   : > { %2170 = vmatpush3.bf16.msra.mxu1 %v2322_v50  ;;  %v2371_v50 = vld [vmem:[%s2987_s7 + $0x94] ss:$8 sps:$4 sm:$0xff]  }
  0xfd   : > { %2171 = vmatprep.subr.bf16.mxu1 %v2446_v17  ;;  %v915_v12 = vpop.f32.mrb[0].mxu0 }
  0xfe   : > { %v2219_v13 = vpop.f32.mrb[1].mxu0 }
  0xff   : > { %v918_v14 = vpop.f32.mrb[2].mxu0 }
 0x100   : > { %2172 = vmatpush3.bf16.msra.mxu1 %v2323_v51  ;;  %v2220_v15 = vpop.f32.mrb[3].mxu0  ;;  %v2369_v51 = vld [vmem:[%s2987_s7 + $0x90] ss:$8 sps:$4 sm:$0xff]  }
 0x101   : > { %2173 = vmatprep.subr.bf16.mxu1 %v2446_v17 }
 0x104   : > { %2174 = vmatpush3.bf16.msra.mxu1 %v2324_v52  ;;  %v2374_v52 = vld [vmem:[%s2987_s7 + $0xa4] ss:$8 sps:$4 sm:$0xff]  }
 0x105   : > { %2175 = vmatprep.subr.bf16.mxu1 %v2446_v17 }
 0x108   : > { %2176 = vmatpush3.bf16.msra.mxu1 %v2325_v53  ;;  %v2372_v53 = vld [vmem:[%s2987_s7 + $0xa0] ss:$8 sps:$4 sm:$0xff]  }
 0x109   : > { %2181 = vmatprep.subr.bf16.mxu1 %v2446_v17 }
 0x10b   : > { %2178 = vmatmul.mubr.bf16.vlgmr.msra.gmra.mrb[4].mxu1 %v619_v20 }
 0x10c   : > { %2182 = vmatpush3.bf16.msra.mxu1 %v2326_v54  ;;  %2197 = vmatprep.mubr.msk.bf16.mxu1 %vm2447_vm1, %v2446_v17  ;;  %v2377_v54 = vld [vmem:[%s2987_s7 + $0xb4] ss:$8 sps:$4 sm:$0xff]  }
 0x10d   : > { %2183 = vmatprep.subr.bf16.mxu1 %v2446_v17 }
 0x110   : > { %2184 = vmatpush3.bf16.msra.mxu1 %v2328_v55  ;;  %v2375_v55 = vld [vmem:[%s2987_s7 + $0xb0] ss:$8 sps:$4 sm:$0xff]  }
 0x111   : > { %2185 = vmatprep.subr.bf16.mxu1 %v2446_v17 }
 0x114   : > { %2186 = vmatpush3.bf16.msra.mxu1 %v2330_v56  ;;  %v2380_v56 = vld [vmem:[%s2987_s7 + $0xc4] ss:$8 sps:$4 sm:$0xff]  }
 0x115   : > { %2187 = vmatprep.subr.bf16.mxu1 %v2446_v17 }
 0x118   : > { %2188 = vmatpush3.bf16.msra.mxu1 %v2332_v57  ;;  %v2378_v57 = vld [vmem:[%s2987_s7 + $0xc0] ss:$8 sps:$4 sm:$0xff]  }
 0x119   : > { %2189 = vmatprep.subr.bf16.mxu1 %v2446_v17 }
 0x11c   : > { %2190 = vmatpush3.bf16.msra.mxu1 %v2334_v58  ;;  %v2383_v58 = vld [vmem:[%s2987_s7 + $0xd4] ss:$8 sps:$4 sm:$0xff]  }
 0x11d   : > { %2191 = vmatprep.subr.bf16.mxu1 %v2446_v17 }
 0x120   : > { %2192 = vmatpush3.bf16.msra.mxu1 %v2336_v59  ;;  %v2381_v59 = vld [vmem:[%s2987_s7 + $0xd0] ss:$8 sps:$4 sm:$0xff]  }
 0x121   : > { %2193 = vmatprep.subr.bf16.mxu1 %v2446_v17 }
 0x124   : > { %2194 = vmatpush3.bf16.msra.mxu1 %v2338_v60  ;;  %v2386_v60 = vld [vmem:[%s2987_s7 + $0xe4] ss:$8 sps:$4 sm:$0xff]  }
 0x125   : > { %2195 = vmatprep.subr.bf16.mxu1 %v2446_v17 }
 0x128   : > { %2196 = vmatpush3.bf16.msra.mxu1 %v2340_v61  ;;  %v2384_v61 = vld [vmem:[%s2987_s7 + $0xe0] ss:$8 sps:$4 sm:$0xff]  }
 0x129   : > { %2221 = vmatprep.subr.bf16.mxu1 %v2446_v17 }
 0x12b   : > { %2198 = vmatmul.mubr.msk.bf16.vlgmr.msra.gmra.mrb[8].mxu1 %vm2722_vm8, %v2611_v33  ;;  %v2363_v33 = vld [vmem:[%s2985_s5 + $0xa8] sm:$0xff]  }
 0x12c   : > { %2222 = vmatpush3.bf16.msra.mxu1 %v2342_v63  ;;  %2237 = vmatprep.mubr.msk.bf16.mxu1 %vm2447_vm1, %v2446_v17  ;;  %v2389_v63 = vld [vmem:[%s2987_s7 + $0xf4] ss:$8 sps:$4 sm:$0xff]  }
 0x12d   : > { %2223 = vmatprep.subr.bf16.mxu1 %v2446_v17 }
 0x130   : > { %2224 = vmatpush3.bf16.msra.mxu1 %v2343_v0  ;;  %v2387_v0 = vld [vmem:[%s2987_s7 + $0xf0] ss:$8 sps:$4 sm:$0xff]  }
 0x131   : > { %2225 = vmatprep.subr.bf16.mxu1 %v2446_v17 }
 0x134   : > { %2226 = vmatpush3.bf16.msra.mxu1 %v2345_v1  ;;  %v2392_v1 = vld [vmem:[%s2987_s7 + $0x4] ss:$8 sps:$4 sm:$0xff]  }
 0x135   : > { %2227 = vmatprep.subr.bf16.mxu1 %v2446_v17 }
 0x138   : > { %2228 = vmatpush3.bf16.msra.mxu1 %v2347_v2 }
 0x139   : > { %2229 = vmatprep.subr.bf16.mxu1 %v2446_v17 }
 0x13c   : > { %2230 = vmatpush3.bf16.msra.mxu1 %v2349_v3 }
 0x13d   : > { %2231 = vmatprep.subr.bf16.mxu1 %v2446_v17 }
 0x140   : > { %2232 = vmatpush3.bf16.msra.mxu1 %v2351_v4 }
 0x141   : > { %2233 = vmatprep.subr.bf16.mxu1 %v2446_v17 }
 0x144   : > { %2234 = vmatpush3.bf16.msra.mxu1 %v2353_v6 }
 0x145   : > { %2235 = vmatprep.subr.bf16.mxu1 %v2446_v17 }
 0x148   : > { %2236 = vmatpush3.bf16.msra.mxu1 %v2355_v8 }
 0x149   : > { %2261 = vmatprep.subr.bf16.mxu1 %v2446_v17 }
 0x1be   : > { %v2160_v16 = vpop.f32.mrb[2].mxu1 }
 0x1bf   : > { %v927_v18 = vrot.slane %v2160_v16, 7  ;;  %v933_v19 = vrot.slane %v2160_v16, 1  ;;  %v577_v20 = vpop.f32.mrb[3].mxu1 }
 0x1c0   : > { %v926_v22 = vrot.slane %v577_v20, 7  ;;  %v932_v23 = vrot.slane %v577_v20, 1  ;;  %v955_v24 = vpack.c.bf16 %v2160_v16, %v577_v20  ;;  %v1976_v16 = vld [vmem:[%s2986_s6] ss:$0 sm:$0xff] }
 0x1c2   : > { %v928_v25 = vsel %vm588_vm2, %v926_v22, %v927_v18  ;;  %v934_v26 = vsel %vm595_vm3, %v932_v23, %v933_v19  ;;  %2238 = vmatmul.mubr.bf16.vlgmr.msra.gmra.mrb[12].mxu1 %v955_v24  ;;  %v1281_v24 = vpop.permute.xlu0 %1280 }
 0x1c3   : > { %v1947_v27 = vpack.c.bf16 %v928_v25, %v926_v22  ;;  %v1974_v28 = vpack.c.bf16 %v933_v19, %v934_v26  ;;  %2262 = vmatpush3.bf16.msra.mxu1 %v2358_v21  ;;  %2277 = vmatprep.mubr.msk.bf16.mxu1 %vm2447_vm1, %v2446_v17 }
 0x1c4   : > { %2263 = vmatprep.subr.bf16.mxu1 %v2446_v17 }
 0x1c5   : > { %2258 = vmatmul.mubr.msk.bf16.vlgmr.msra.gmra.mrb[4].mxu0 %vm2722_vm8, %v1947_v27 }
 0x1c6   : > { %1448 = vmatprep.mubr.bf16.mxu0 %v2449_v10 }
 0x1c7   : > { %2264 = vmatpush3.bf16.msra.mxu1 %v2359_v29 }
 0x1c8   : > { %2265 = vmatprep.subr.bf16.mxu1 %v2446_v17 }
 0x1cb   : > { %2266 = vmatpush3.bf16.msra.mxu1 %v2360_v30 }
 0x1cc   : > { %2267 = vmatprep.subr.bf16.mxu1 %v2446_v17 }
 0x1cf   : > { %2268 = vmatpush3.bf16.msra.mxu1 %v2361_v31  ;;  %v2390_v31 = vld [vmem:[%s2987_s7] ss:$8 sps:$4 sm:$0xff]  }
 0x1d0   : > { %2269 = vmatprep.subr.bf16.mxu1 %v2446_v17 }
 0x1d3   : > { %2270 = vmatpush3.bf16.msra.mxu1 %v2362_v32 }
 0x1d4   : > { %2271 = vmatprep.subr.bf16.mxu1 %v2446_v17 }
 0x1d7   : > { %2272 = vmatpush3.bf16.msra.mxu1 %v2363_v33 }
 0x1d8   : > { %2273 = vmatprep.subr.bf16.mxu1 %v2446_v17 }
 0x1db   : > { %2274 = vmatpush3.bf16.msra.mxu1 %v2364_v34 }
 0x1dc   : > { %2275 = vmatprep.subr.bf16.mxu1 %v2446_v17  ;;  %v2366_v17 = vld [vmem:[%s2987_s7 + $0x80] ss:$8 sps:$4 sm:$0xff]  }
 0x1dd   : > { %1417 = vmatpush1.bf16.msra.mxu0 %v2366_v17  ;;  %v2407_v17 = vld [vmem:[%s2987_s7 + $0x54] ss:$8 sps:$4 sm:$0xff]  }
 0x1de   : > { %v719_v37 = vpop.f32.mrb[4].mxu1  ;;  %1418 = vmatprep.subr.bf16.mxu0 %v2371_v50  ;;  %v2410_v50 = vld [vmem:[%s2987_s7 + $0x64] ss:$8 sps:$4 sm:$0xff]  }
 0x1df   : > { %2276 = vmatpush3.bf16.msra.mxu1 %v2365_v35  ;;  %v2179_v38 = vpop.f32.mrb[5].mxu1 }
 0x1e0   : > { %v722_v39 = vpop.f32.mrb[6].mxu1 }
 0x1e1   : > { %v2180_v40 = vpop.f32.mrb[7].mxu1  ;;  %1419 = vmatpush1.bf16.msra.mxu0 %v2369_v51  ;;  %v2408_v51 = vld [vmem:[%s2987_s7 + $0x60] ss:$8 sps:$4 sm:$0xff]  }
 0x1e2   : > { %2278 = vmatmul.mubr.msk.bf16.vlgmr.msra.gmra.mrb[16].mxu1 %vm2618_vm5, %v1974_v28  ;;  %1420 = vmatprep.subr.bf16.mxu0 %v2374_v52  ;;  %v2413_v52 = vld [vmem:[%s2987_s7 + $0x74] ss:$8 sps:$4 sm:$0xff]  }
 0x1e5   : > { %1421 = vmatpush1.bf16.msra.mxu0 %v2372_v53  ;;  %v2411_v53 = vld [vmem:[%s2987_s7 + $0x70] ss:$8 sps:$4 sm:$0xff]  }
 0x1e6   : > { %1422 = vmatprep.subr.bf16.mxu0 %v2377_v54  ;;  %v2416_v54 = vld [vmem:[%s2987_s7 + $0x104] ss:$8 sps:$4 sm:$0xff]  }
 0x1e9   : > { %1423 = vmatpush1.bf16.msra.mxu0 %v2375_v55  ;;  %v2414_v55 = vld [vmem:[%s2987_s7 + $0x100] ss:$8 sps:$4 sm:$0xff]  }
 0x1ea   : > { %1424 = vmatprep.subr.bf16.mxu0 %v2380_v56  ;;  %v2419_v56 = vld [vmem:[%s2987_s7 + $0x114] ss:$8 sps:$4 sm:$0xff]  }
 0x1ed   : > { %1425 = vmatpush1.bf16.msra.mxu0 %v2378_v57  ;;  %v2417_v57 = vld [vmem:[%s2987_s7 + $0x110] ss:$8 sps:$4 sm:$0xff]  }
 0x1ee   : > { %1426 = vmatprep.subr.bf16.mxu0 %v2383_v58  ;;  %v2422_v58 = vld [vmem:[%s2987_s7 + $0x124] ss:$8 sps:$4 sm:$0xff]  }
 0x1f1   : > { %1427 = vmatpush1.bf16.msra.mxu0 %v2381_v59  ;;  %v2420_v59 = vld [vmem:[%s2987_s7 + $0x120] ss:$8 sps:$4 sm:$0xff]  }
 0x1f2   : > { %1428 = vmatprep.subr.bf16.mxu0 %v2386_v60  ;;  %v2428_v60 = vld [vmem:[%s2987_s7 + $0x144] ss:$8 sps:$4 sm:$0xff]  }
 0x1f5   : > { %1429 = vmatpush1.bf16.msra.mxu0 %v2384_v61  ;;  %v2426_v61 = vld [vmem:[%s2987_s7 + $0x140] ss:$8 sps:$4 sm:$0xff]  }
 0x1f6   : > { %1430 = vmatprep.subr.bf16.mxu0 %v2389_v63  ;;  %v2431_v63 = vld [vmem:[%s2987_s7 + $0x154] ss:$8 sps:$4 sm:$0xff]  }
 0x1f9   : > { %1431 = vmatpush1.bf16.msra.mxu0 %v2387_v0  ;;  %v2429_v0 = vld [vmem:[%s2987_s7 + $0x150] ss:$8 sps:$4 sm:$0xff]  }
 0x1fa   : > { %1539 = vmatprep.subr.bf16.mxu0 %v2392_v1  ;;  %v2434_v1 = vld [vmem:[%s2987_s7 + $0x164] ss:$8 sps:$4 sm:$0xff]  }
 0x1fe   : > { %v808_v41 = vpop.f32.mrb[8].mxu1 }
 0x1ff   : > { %v809_v42 = vadd.f32 %v808_v41, %v719_v37  ;;  %v2199_v43 = vpop.f32.mrb[9].mxu1  ;;  %v2395_v37 = vld [vmem:[%s2987_s7 + $0x14] ss:$8 sps:$4 sm:$0xff]  }
 0x200   : > { %v811_v44 = vpop.f32.mrb[10].mxu1  ;;  %v2398_v43 = vld [vmem:[%s2987_s7 + $0x24] ss:$8 sps:$4 sm:$0xff]  }
 0x201   : > { %v812_v45 = vadd.f32 %v811_v44, %v722_v39  ;;  %v922_v46 = vadd.f32 %v915_v12, %v809_v42  ;;  %v2200_v47 = vpop.f32.mrb[11].mxu1  ;;  %v2393_v42 = vld [vmem:[%s2987_s7 + $0x10] ss:$8 sps:$4 sm:$0xff]   ;;  %v2396_v44 = vld [vmem:[%s2987_s7 + $0x20] ss:$8 sps:$4 sm:$0xff]  }
 0x202   : > { %v2404_v47 = vld [vmem:[%s2987_s7 + $0x44] ss:$8 sps:$4 sm:$0xff]  }
 0x203   : > { %v923_v48 = vadd.f32 %v918_v14, %v812_v45  ;;  %v2401_v45 = vld [vmem:[%s2987_s7 + $0x34] ss:$8 sps:$4 sm:$0xff]  }
 0x295   : > { %v1055_v2 = vpop.f32.mrb[12].mxu1 }
 0x296   : > { %v2239_v3 = vpop.f32.mrb[13].mxu1 }
 0x297   : > { %v1058_v4 = vpop.f32.mrb[14].mxu1  ;;  %v2437_v3 = vld [vmem:[%s2987_s7 + $0x174] ss:$8 sps:$4 sm:$0xff]  }
 0x298   : > { %v2240_v5 = vpop.f32.mrb[15].mxu1  ;;  %v1144_v6 = vpop.f32.mrb[4].mxu0 }
 0x299   : > { %v1145_v7 = vadd.f32 %v1144_v6, %v1055_v2  ;;  %v2259_v8 = vpop.f32.mrb[5].mxu0  ;;  %v2432_v2 = vld [vmem:[%s2987_s7 + $0x160] ss:$8 sps:$4 sm:$0xff]   ;;  %v1729_v5 = vlaneseq }
 0x29a   : > { %v1147_v9 = vpop.f32.mrb[6].mxu0  ;;  %v1727_v8 = vld [vmem:[%s2988_s8] sm:$0x3] }
 0x29b   : > { %v1148_v11 = vadd.f32 %v1147_v9, %v1058_v4  ;;  %v2260_v12 = vpop.f32.mrb[7].mxu0  ;;  %v2435_v4 = vld [vmem:[%s2987_s7 + $0x170] ss:$8 sps:$4 sm:$0xff]   ;;  %v1730_v6 = vshrl.u32 %v1729_v5, 7 }
 0x29d   : > { %v1735_v9 = vsub.s32 1, %v1730_v6 }
 0x29f   : > { %v1736_v12 = vrot.slane %v1727_v8, %v1735_v9 }
 0x2b5   : > { %v1251_v13 = vpop.f32.mrb[16].mxu1 }
 0x2b6   : > { %v1258_v14 = vadd.f32 %v1251_v13, %v1145_v7  ;;  %v2279_v15 = vpop.f32.mrb[17].mxu1  ;;  %v1731_v7 = vsub.s32 0, %v1730_v6 }
 0x2b7   : > { %v1254_v18 = vpop.f32.mrb[18].mxu1 }
 0x2b8   : > { %v1260_v19 = vadd.f32 %v1258_v14, %v922_v46  ;;  %v1259_v20 = vadd.f32 %v1254_v18, %v1148_v11  ;;  %v2280_v21 = vpop.f32.mrb[19].mxu1  ;;  %v2399_v46 = vld [vmem:[%s2987_s7 + $0x30] ss:$8 sps:$4 sm:$0xff]   ;;  %v1732_v11 = vrot.slane %v1727_v8, %v1731_v7 }
 0x2ba   : > { %v1269_v22 = vadd.f32 %v1976_v16, %v1260_v19  ;;  %v1261_v23 = vadd.f32 %v1259_v20, %v923_v48  ;;  %v2402_v48 = vld [vmem:[%s2987_s7 + $0x40] ss:$8 sps:$4 sm:$0xff]  }
 0x2bc   : > { %v1270_v25 = vadd.f32 %v1976_v16, %v1261_v23  ;;  %vm1271_vm9 = vcmp.gt.f32.partialorder %v1269_v22, 0.0  ;;  %v1283_v26 = vmul.f32 %v1281_v24, %v1269_v22  ;;  %v1755_v16 = vpop.permute.xlu0 %1754 }
 0x2be   : > { %vm1272_vm10 = vcmp.gt.f32.partialorder %v1270_v25, 0.0  ;;  %v1284_v27 = vmul.f32 %v1281_v24, %v1270_v25  ;;  %v1285_v28 = vsel %vm1271_vm9, %v1269_v22, %v1283_v26 }
 0x2bf   : > { %v1289_v30 = vrot.slane %v1285_v28, 7  ;;  %v1295_v33 = vrot.slane %v1285_v28, 1 }
 0x2c0   : > { %v1286_v29 = vsel %vm1272_vm10, %v1270_v25, %v1284_v27 }
 0x2c1   : > { %v1290_v32 = vrot.slane %v1286_v29, 7  ;;  %v1296_v34 = vrot.slane %v1286_v29, 1  ;;  %v1318_v35 = vpack.c.bf16 %v1286_v29, %v1285_v28 }
 0x2c3   : > { %v1291_v38 = vsel %vm588_vm2, %v1289_v30, %v1290_v32  ;;  %v1297_v39 = vsel %vm595_vm3, %v1295_v33, %v1296_v34  ;;  %1449 = vmatmul.mubr.bf16.vlgmr.msra.gmra.mrb[8].mxu0 %v1318_v35 }
 0x2c4   : > { %v2028_v40 = vpack.c.bf16 %v1291_v38, %v1289_v30  ;;  %v2874_v41 = vpack.c.bf16 %v1296_v34, %v1297_v39  ;;  %1540 = vmatpush1.bf16.msra.mxu0 %v2390_v31  ;;  %1571 = vmatprep.mubr.bf16.mxu0 %v2449_v10 }
 0x2c5   : > { %1541 = vmatprep.subr.bf16.mxu0 %v2395_v37 }
 0x2c8   : > { %1542 = vmatpush1.bf16.msra.mxu0 %v2393_v42 }
 0x2c9   : > { %1543 = vmatprep.subr.bf16.mxu0 %v2398_v43 }
 0x2cc   : > { %1544 = vmatpush1.bf16.msra.mxu0 %v2396_v44 }
 0x2cd   : > { %1545 = vmatprep.subr.bf16.mxu0 %v2401_v45 }
 0x2d0   : > { %1546 = vmatpush1.bf16.msra.mxu0 %v2399_v46 }
 0x2d1   : > { %1547 = vmatprep.subr.bf16.mxu0 %v2404_v47 }
 0x2d4   : > { %1548 = vmatpush1.bf16.msra.mxu0 %v2402_v48 }
 0x2d5   : > { %1549 = vmatprep.subr.bf16.mxu0 %v2407_v17 }
 0x2d8   : > { %1550 = vmatpush1.bf16.msra.mxu0 %v2405_v49 }
 0x2d9   : > { %1551 = vmatprep.subr.bf16.mxu0 %v2410_v50 }
 0x2dc   : > { %1552 = vmatpush1.bf16.msra.mxu0 %v2408_v51 }
 0x2dd   : > { %1553 = vmatprep.subr.bf16.mxu0 %v2413_v52 }
 0x2e0   : > { %1554 = vmatpush1.bf16.msra.mxu0 %v2411_v53 }
 0x2e1   : > { %1680 = vmatprep.subr.bf16.mxu0 %v2416_v54 }
 0x2e3   : > { %2029 = vmatmul.mubr.msk.bf16.vlgmr.msra.gmra.mrb[8].mxu0 %vm2722_vm8, %v2028_v40 }
 0x2e4   : > { %1681 = vmatpush1.bf16.msra.mxu0 %v2414_v55  ;;  %1712 = vmatprep.mubr.bf16.mxu0 %v2449_v10  ;;  %v2423_v10 = vld [vmem:[%s2987_s7 + $0x130] ss:$8 sps:$4 sm:$0xff]  }
 0x2e5   : > { %1682 = vmatprep.subr.bf16.mxu0 %v2419_v56 }
 0x2e8   : > { %1683 = vmatpush1.bf16.msra.mxu0 %v2417_v57 }
 0x2e9   : > { %1684 = vmatprep.subr.bf16.mxu0 %v2422_v58 }
 0x2ec   : > { %1685 = vmatpush1.bf16.msra.mxu0 %v2420_v59 }
 0x2ed   : > { %1686 = vmatprep.subr.bf16.mxu0 %v2425_v62 }
 0x2f0   : > { %1687 = vmatpush1.bf16.msra.mxu0 %v2423_v10 }
 0x2f1   : > { %1688 = vmatprep.subr.bf16.mxu0 %v2428_v60 }
 0x2f4   : > { %1689 = vmatpush1.bf16.msra.mxu0 %v2426_v61 }
 0x2f5   : > { %1690 = vmatprep.subr.bf16.mxu0 %v2431_v63 }
 0x2f8   : > { %1691 = vmatpush1.bf16.msra.mxu0 %v2429_v0 }
 0x2f9   : > { %1692 = vmatprep.subr.bf16.mxu0 %v2434_v1 }
 0x2fc   : > { %1693 = vmatpush1.bf16.msra.mxu0 %v2432_v2 }
 0x2fd   : > { %1694 = vmatprep.subr.bf16.mxu0 %v2437_v3 }
 0x300   : > { %1695 = vmatpush1.bf16.msra.mxu0 %v2435_v4 }
 0x303   : > { %2064 = vmatmul.mubr.msk.bf16.vlgmr.msra.gmra.mrb[8].mxu0 %vm2618_vm5, %v2874_v41 }
 0x3d6   : > { %v1714_v13 = vpop.f32.mrb[8].mxu0 }
 0x3d7   : > { %v1739_v14 = vadd.f32 %v1732_v11, %v1714_v13  ;;  %v1716_v15 = vpop.f32.mrb[9].mxu0 }
 0x3d8   : > { %v1740_v18 = vadd.f32 %v1736_v12, %v1716_v15  ;;  %v1718_v19 = vpop.f32.mrb[10].mxu0 }
 0x3d9   : > { %vm1743_vm11 = vcmp.gt.f32.partialorder %v1739_v14, 0.0  ;;  %v1757_v36 = vmul.f32 %v1755_v16, %v1739_v14  ;;  %v1741_v20 = vadd.f32 %v1732_v11, %v1718_v19  ;;  %v1720_v21 = vpop.f32.mrb[11].mxu0 }
 0x3da   : > { %vm1744_vm12 = vcmp.gt.f32.partialorder %v1740_v18, 0.0  ;;  %v1758_v22 = vmul.f32 %v1755_v16, %v1740_v18  ;;  %v1742_v23 = vadd.f32 %v1736_v12, %v1720_v21 }
 0x3db   : > { %v1761_v24 = vsel %vm1743_vm11, %v1739_v14, %v1757_v36  ;;  %vm1745_vm13 = vcmp.gt.f32.partialorder %v1741_v20, 0.0  ;;  %v1759_v25 = vmul.f32 %v1755_v16, %v1741_v20 }
 0x3dc   : > { %1765 = vst [vmem:[%s407_s20] sm:$0xff] %v1761_v24  ;;  %v1762_v26 = vsel %vm1744_vm12, %v1740_v18, %v1758_v22  ;;  %vm1746_vm14 = vcmp.gt.f32.partialorder %v1742_v23, 0.0  ;;  %v1760_v27 = vmul.f32 %v1755_v16, %v1742_v23 }
 0x3dd   : > { %1766 = vst [vmem:[%s407_s20 + $0x8] sm:$0xff] %v1762_v26  ;;  %v1763_v28 = vsel %vm1745_vm13, %v1741_v20, %v1759_v25 }
 0x3de   : > { %1767 = vst [vmem:[%s407_s20 + $0x10] sm:$0xff] %v1763_v28  ;;  %v1764_v29 = vsel %vm1746_vm14, %v1742_v23, %v1760_v27 }
 0x3df   : > { %1768 = vst [vmem:[%s407_s20 + $0x18] sm:$0xff] %v1764_v29 }
 0x3e0 PF: > { %s25_s21 = sadd.s32 1, %s2444_s21  }
 0x3e1   : > { %p22_p4 = scmp.ge.s32.totalorder %s25_s21, 4  }
 0x3e3   :  { %24 = sbr.rel (!%p22_p4) target bundleno = 3 (0x3), region = 103 }

</bundles_post_ra>
